<compile_context>
chip_gen: v7x
topology: tpu7x:2x2x1
jax: 0.10.0
libtpu: 0.0.40
codegen_flags: <defaults>
</compile_context>

<pallas_src>
import functools
import math

import jax
import jax.numpy as jnp
from jax import lax
from jax.experimental import pallas as pl
from jax.experimental.pallas import tpu as pltpu


def _round_up(x, m):
    return (x + m - 1) // m * m


# --------------------------------------------------------------------------
# Kernel bodies
# --------------------------------------------------------------------------
def _attention_body(te_ref, dy_ref, mask_ref, out_ref, *, T, D, inv_temp, chunk_rows):
    """Shared body; mask_ref is None for the unmasked specialization.

    te_ref   : (block_n, D)      f32-convertible   time embedding rows (already gathered)
    dy_ref   : (block_n, T*D)    lane-dense        Dy rows, t-major within the row
    mask_ref : (block_n, W)      uint32            bit-packed mask (bit t of word t//32)
    out_ref  : (block_n, D)
    """
    block_n = out_ref.shape[0]
    n_chunks = block_n // chunk_rows
    neg_max = float(-jnp.finfo(jnp.float32).max)
    # Lane-index constant used to place per-t scalar scores into a dense (c, T) row.
    lane_t = lax.broadcasted_iota(jnp.int32, (1, T), 1)

    @pl.loop(0, n_chunks)
    def _chunk(ci):
        c0 = pl.multiple_of(ci * chunk_rows, chunk_rows)
        rows = pl.ds(c0, chunk_rows)

        te = te_ref[rows, :].astype(jnp.float32) * inv_temp          # (c, D)
        dyf = dy_ref[rows, :].astype(jnp.float32)                    # (c, T*D)
        mw = mask_ref[rows, :] if mask_ref is not None else None     # (c, W) uint32

        # ---- pass 1: per-t scores assembled into one dense (c, T) tensor ----
        score = jnp.zeros((chunk_rows, T), jnp.float32)
        for t in range(T):
            dy_t = dyf[:, t * D:(t + 1) * D]                          # (c, D) lane slice
            s_t = jnp.sum(te * dy_t, axis=-1, keepdims=True)          # (c, 1)
            if mw is not None:
                bit = (mw[:, t // 32:t // 32 + 1] >> (t % 32)) & 1    # (c, 1)
                s_t = jnp.where(bit != 0, neg_max, s_t)
            score = score + jnp.where(lane_t == t, s_t, 0.0)          # place in lane t

        # ---- numerically stable softmax over T; normalization deferred ------
        smax = jnp.max(score, axis=-1, keepdims=True)
        e = jnp.exp(score - smax)                                     # (c, T)
        denom = jnp.sum(e, axis=-1, keepdims=True)                    # (c, 1)

        # ---- pass 2: unnormalized weighted sum over t, normalize once -------
        acc = jnp.zeros((chunk_rows, D), jnp.float32)
        for t in range(T):
            acc = acc + e[:, t:t + 1] * dyf[:, t * D:(t + 1) * D]
        att = acc * pl.reciprocal(denom, approx=False)                # exact, (c, D)
        out_ref[rows, :] = att.astype(out_ref.dtype)


def _kernel_nomask(te_ref, dy_ref, out_ref, **kw):
    _attention_body(te_ref, dy_ref, None, out_ref, **kw)


def _kernel_masked(te_ref, dy_ref, mask_ref, out_ref, **kw):
    _attention_body(te_ref, dy_ref, mask_ref, out_ref, **kw)


# --------------------------------------------------------------------------
# Wrapper
# --------------------------------------------------------------------------
_VMEM_LIMIT_BYTES = 32 * 1024 * 1024   # > v5e 16 MiB scoped default, << v7x 64 MiB physical
_VMEM_BLOCK_BUDGET = 20 * 1024 * 1024  # double-buffered working-set budget


def _block_vmem_bytes(block_n, T, D, mask_words, in_itemsize, out_itemsize):
    """Lane-padded, double-buffered VMEM bytes per grid step."""
    lanes_dy = _round_up(T * D, 128)        # dy block is already lane-dense
    lanes_d = _round_up(D, 128)             # te / out blocks lane-pad D -> 128
    per_row = lanes_dy * in_itemsize + lanes_d * in_itemsize + lanes_d * out_itemsize
    if mask_words:
        per_row += _round_up(mask_words, 128) * 4
    return 2 * block_n * per_row


def time_attention(T_idx, Dy_U_embed, emb_weight, mask=None, epsilon=1e-6,
                   block_n=2048, chunk_rows=32):
    """T_idx: (B,U) int; Dy_U_embed: (B,U,T,D); emb_weight: (time_size, D); mask: (B,U,T)."""
    B, U, T, D = Dy_U_embed.shape
    N = B * U
    out_dtype = Dy_U_embed.dtype
    in_itemsize = jnp.dtype(Dy_U_embed.dtype).itemsize
    out_itemsize = jnp.dtype(out_dtype).itemsize
    mask_words = 0 if mask is None else (T + 31) // 32

    # ---- tile sizing ------------------------------------------------------
    chunk_rows = max(8, (int(chunk_rows) // 8) * 8)
    chunk_rows = min(chunk_rows, _round_up(N, 8))
    block_n = max(chunk_rows, _round_up(int(block_n), chunk_rows))
    # Never larger than the problem; keep >= 2 grid steps when the problem is big
    # enough so both v7x TensorCores get work (row axis is "parallel" below).
    if N > 2 * chunk_rows:
        block_n = min(block_n, _round_up(pl.cdiv(N, 2), chunk_rows))
    else:
        block_n = min(block_n, _round_up(N, chunk_rows))
    # Shrink to the VMEM budget (uses the real lane-dense width T*D).
    while (block_n > chunk_rows and
           _block_vmem_bytes(block_n, T, D, mask_words, in_itemsize, out_itemsize)
           > _VMEM_BLOCK_BUDGET):
        block_n = max(chunk_rows, _round_up(block_n // 2, chunk_rows))
    n_steps = pl.cdiv(N, block_n)   # tail block handled by Pallas; no jnp.pad copies

    # ---- JAX-side glue (cheap) --------------------------------------------
    # TODO(synk): embedding gather kept in XLA (tiny (N, D) stream); an in-kernel
    # one_hot(T_idx) @ emb_weight on the MXU would remove this HBM round-trip.
    te = jnp.take(emb_weight, T_idx.reshape(N).astype(jnp.int32), axis=0)   # (N, D)
    dy = Dy_U_embed.reshape(N, T * D)   # free reshape: lane-dense kernel stream

    temperature = float(D) ** 0.5 + float(epsilon)
    inv_temp = 1.0 / temperature

    in_specs = [
        pl.BlockSpec((block_n, D), lambda i: (i, 0)),
        pl.BlockSpec((block_n, T * D), lambda i: (i, 0)),
    ]
    inputs = [te, dy]
    kw = dict(T=T, D=D, inv_temp=inv_temp, chunk_rows=chunk_rows)
    if mask is None:
        kernel = functools.partial(_kernel_nomask, **kw)
        mask_bytes = 0
    else:
        # Bit-pack the (N, T) boolean mask into ceil(T/32) uint32 words per row.
        m = mask.reshape(N, T).astype(jnp.uint32)
        words = []
        for w in range(mask_words):
            lo, hi = w * 32, min(w * 32 + 32, T)
            sh = jnp.arange(hi - lo, dtype=jnp.uint32)
            words.append(jnp.sum(m[:, lo:hi] << sh[None, :], axis=1, dtype=jnp.uint32))
        mpacked = jnp.stack(words, axis=1)                                  # (N, W)
        in_specs.append(pl.BlockSpec((block_n, mask_words), lambda i: (i, 0)))
        inputs.append(mpacked)
        kernel = functools.partial(_kernel_masked, **kw)
        mask_bytes = N * mask_words * 4

    cost = pl.CostEstimate(
        flops=N * (4 * T * D + 8 * T),
        transcendentals=N * T,
        bytes_accessed=(N * T * D * in_itemsize + N * D * in_itemsize
                        + N * D * out_itemsize + mask_bytes),
    )

    out = pl.pallas_call(
        kernel,
        out_shape=jax.ShapeDtypeStruct((N, D), out_dtype),
        grid_spec=pltpu.PrefetchScalarGridSpec(
            num_scalar_prefetch=0,
            grid=(n_steps,),
            in_specs=in_specs,
            out_specs=pl.BlockSpec((block_n, D), lambda i: (i, 0)),
        ),
        compiler_params=pltpu.CompilerParams(
            dimension_semantics=("parallel",),
            vmem_limit_bytes=_VMEM_LIMIT_BYTES,
        ),
        cost_estimate=cost,
    )(*inputs)
    return out.reshape(B, U, D)


# --------------------------------------------------------------------------
# Plain-JAX reference mirroring the PyTorch forward
# --------------------------------------------------------------------------
def time_attention_ref(T_idx, Dy_U_embed, emb_weight, mask=None, epsilon=1e-6):
    D = Dy_U_embed.shape[-1]
    temperature = D ** 0.5 + epsilon
    T_embed = jnp.take(emb_weight, T_idx, axis=0)                    # (B, U, D)
    affine = jnp.einsum('bud,butd->but', T_embed, Dy_U_embed,
                        precision=jax.lax.Precision.HIGHEST)
    score = affine / temperature
    if mask is not None:
        score = jnp.where(mask, -jnp.finfo(score.dtype).max, score)
    alpha = jax.nn.softmax(score, axis=-1)
    return jnp.sum(alpha[..., None] * Dy_U_embed, axis=2)


if __name__ == "__main__":
    key = jax.random.PRNGKey(0)
    k_emb, k_idx, k_dy, k_m, k_idx2, k_dy2, k_m2 = jax.random.split(key, 7)

    # --- small shapes consistent with the module forward --------------------
    B, U, T, D = 2, 4, 8, 32
    time_size = 16

    # Deterministic xavier_normal_-style init for the embedding weight.
    std = math.sqrt(2.0 / (time_size + D))
    emb_weight = std * jax.random.normal(k_emb, (time_size, D), dtype=jnp.float32)
    T_idx = jax.random.randint(k_idx, (B, U), 0, time_size, dtype=jnp.int32)
    Dy = jax.random.normal(k_dy, (B, U, T, D), dtype=jnp.float32)
    mask = jax.random.bernoulli(k_m, 0.3, (B, U, T))

    # Unmasked path (no mask stream in the kernel).
    att = jax.block_until_ready(time_attention(T_idx, Dy, emb_weight))
    ref = time_attention_ref(T_idx, Dy, emb_weight)
    assert att.shape == (B, U, D)
    assert jnp.allclose(att, ref, atol=1e-5, rtol=1e-5), "unmasked mismatch vs reference"

    # Masked path (includes a fully-masked row -> uniform 1/T average).
    mask = mask.at[0, 0, :].set(True)
    att_m = jax.block_until_ready(time_attention(T_idx, Dy, emb_weight, mask=mask))
    ref_m = time_attention_ref(T_idx, Dy, emb_weight, mask=mask)
    assert jnp.allclose(att_m, ref_m, atol=1e-5, rtol=1e-5), "masked mismatch vs reference"

    # Exercise the non-divisible tail block, multi-step grid and in-kernel chunking.
    B2, U2 = 2, 100                      # N = 200 -> grid of 2 blocks of 128 (tail clipped)
    T_idx2 = jax.random.randint(k_idx2, (B2, U2), 0, time_size, dtype=jnp.int32)
    Dy2 = jax.random.normal(k_dy2, (B2, U2, T, D), dtype=jnp.float32)
    mask2 = jax.random.bernoulli(k_m2, 0.3, (B2, U2, T))
    att2 = jax.block_until_ready(
        time_attention(T_idx2, Dy2, emb_weight, mask=mask2, block_n=128, chunk_rows=64))
    ref2 = time_attention_ref(T_idx2, Dy2, emb_weight, mask=mask2)
    assert jnp.allclose(att2, ref2, atol=1e-5, rtol=1e-5), "tiled/tail mismatch vs reference"

    print("KERNEL_OK")
</pallas_src>

<mosaic_0001>
module attributes {stable_mosaic.version = 11 : i64} {
  func.func @_kernel_nomask(%arg0: i32, %arg1: memref<8x32xf32, #tpu.memory_space<vmem>>, %arg2: memref<8x256xf32, #tpu.memory_space<vmem>>, %arg3: memref<8x32xf32, #tpu.memory_space<vmem>>) attributes {dimension_semantics = [#tpu.dimension_semantics<parallel>], iteration_bounds = array<i64: 1>, scalar_prefetch = 0 : i64, scratch_operands = 0 : i64, tpu.core_type = #tpu.core_type<tc>, window_params = [{transform_indices = @transform_0, window_bounds = array<i64: 8, 32>}, {transform_indices = @transform_1, window_bounds = array<i64: 8, 256>}, {transform_indices = @transform_2, window_bounds = array<i64: 8, 32>}]} {
    %0 = tpu.iota {dimensions = array<i32: 1>} : vector<1x8xi32>
    %c0_i32 = arith.constant 0 : i32
    %c1_i32 = arith.constant 1 : i32
    %1 = arith.muli %c0_i32, %c1_i32 : i32
    %c0_i32_0 = arith.constant 0 : i32
    %2 = arith.addi %c0_i32_0, %1 : i32
    %c8_i32 = arith.constant 8 : i32
    %3 = arith.muli %2, %c8_i32 : i32
    %4 = tpu.assume_multiple %3, 8 : i32
    %5 = arith.index_cast %4 : i32 to index
    %c0 = arith.constant 0 : index
    %6 = vector.load %arg1[%5, %c0] : memref<8x32xf32, #tpu.memory_space<vmem>>, vector<8x32xf32>
    %cst = arith.constant 0.176776662 : f32
    %7 = vector.broadcast %cst : f32 to vector<8x32xf32>
    %8 = arith.mulf %6, %7 : vector<8x32xf32>
    %9 = arith.index_cast %4 : i32 to index
    %c0_1 = arith.constant 0 : index
    %10 = vector.load %arg2[%9, %c0_1] : memref<8x256xf32, #tpu.memory_space<vmem>>, vector<8x256xf32>
    %cst_2 = arith.constant 0.000000e+00 : f32
    %11 = vector.broadcast %cst_2 : f32 to vector<8x8xf32>
    %12 = vector.extract_strided_slice %10 {offsets = [0, 0], sizes = [8, 32], strides = [1, 1]} : vector<8x256xf32> to vector<8x32xf32>
    %13 = arith.mulf %8, %12 : vector<8x32xf32>
    %cst_3 = arith.constant dense<0.000000e+00> : vector<8xf32>
    %14 = vector.multi_reduction <add>, %13, %cst_3 [1] : vector<8x32xf32> to vector<8xf32>
    %15 = vector.shape_cast %14 : vector<8xf32> to vector<8x1xf32>
    %c0_i32_4 = arith.constant 0 : i32
    %16 = vector.broadcast %c0_i32_4 : i32 to vector<1x8xi32>
    %17 = arith.cmpi eq, %0, %16 : vector<1x8xi32>
    %cst_5 = arith.constant 0.000000e+00 : f32
    %18 = vector.shape_cast %17 : vector<1x8xi1> to vector<1x8xi1>
    %19 = vector.broadcast %18 : vector<1x8xi1> to vector<8x8xi1>
    %20 = vector.shape_cast %15 : vector<8x1xf32> to vector<8x1xf32>
    %21 = vector.broadcast %20 : vector<8x1xf32> to vector<8x8xf32>
    %22 = vector.broadcast %cst_5 : f32 to vector<8x8xf32>
    %23 = arith.select %19, %21, %22 : vector<8x8xi1>, vector<8x8xf32>
    %24 = arith.addf %11, %23 : vector<8x8xf32>
    %25 = vector.extract_strided_slice %10 {offsets = [0, 32], sizes = [8, 32], strides = [1, 1]} : vector<8x256xf32> to vector<8x32xf32>
    %26 = arith.mulf %8, %25 : vector<8x32xf32>
    %cst_6 = arith.constant dense<0.000000e+00> : vector<8xf32>
    %27 = vector.multi_reduction <add>, %26, %cst_6 [1] : vector<8x32xf32> to vector<8xf32>
    %28 = vector.shape_cast %27 : vector<8xf32> to vector<8x1xf32>
    %c1_i32_7 = arith.constant 1 : i32
    %29 = vector.broadcast %c1_i32_7 : i32 to vector<1x8xi32>
    %30 = arith.cmpi eq, %0, %29 : vector<1x8xi32>
    %cst_8 = arith.constant 0.000000e+00 : f32
    %31 = vector.shape_cast %30 : vector<1x8xi1> to vector<1x8xi1>
    %32 = vector.broadcast %31 : vector<1x8xi1> to vector<8x8xi1>
    %33 = vector.shape_cast %28 : vector<8x1xf32> to vector<8x1xf32>
    %34 = vector.broadcast %33 : vector<8x1xf32> to vector<8x8xf32>
    %35 = vector.broadcast %cst_8 : f32 to vector<8x8xf32>
    %36 = arith.select %32, %34, %35 : vector<8x8xi1>, vector<8x8xf32>
    %37 = arith.addf %24, %36 : vector<8x8xf32>
    %38 = vector.extract_strided_slice %10 {offsets = [0, 64], sizes = [8, 32], strides = [1, 1]} : vector<8x256xf32> to vector<8x32xf32>
    %39 = arith.mulf %8, %38 : vector<8x32xf32>
    %cst_9 = arith.constant dense<0.000000e+00> : vector<8xf32>
    %40 = vector.multi_reduction <add>, %39, %cst_9 [1] : vector<8x32xf32> to vector<8xf32>
    %41 = vector.shape_cast %40 : vector<8xf32> to vector<8x1xf32>
    %c2_i32 = arith.constant 2 : i32
    %42 = vector.broadcast %c2_i32 : i32 to vector<1x8xi32>
    %43 = arith.cmpi eq, %0, %42 : vector<1x8xi32>
    %cst_10 = arith.constant 0.000000e+00 : f32
    %44 = vector.shape_cast %43 : vector<1x8xi1> to vector<1x8xi1>
    %45 = vector.broadcast %44 : vector<1x8xi1> to vector<8x8xi1>
    %46 = vector.shape_cast %41 : vector<8x1xf32> to vector<8x1xf32>
    %47 = vector.broadcast %46 : vector<8x1xf32> to vector<8x8xf32>
    %48 = vector.broadcast %cst_10 : f32 to vector<8x8xf32>
    %49 = arith.select %45, %47, %48 : vector<8x8xi1>, vector<8x8xf32>
    %50 = arith.addf %37, %49 : vector<8x8xf32>
    %51 = vector.extract_strided_slice %10 {offsets = [0, 96], sizes = [8, 32], strides = [1, 1]} : vector<8x256xf32> to vector<8x32xf32>
    %52 = arith.mulf %8, %51 : vector<8x32xf32>
    %cst_11 = arith.constant dense<0.000000e+00> : vector<8xf32>
    %53 = vector.multi_reduction <add>, %52, %cst_11 [1] : vector<8x32xf32> to vector<8xf32>
    %54 = vector.shape_cast %53 : vector<8xf32> to vector<8x1xf32>
    %c3_i32 = arith.constant 3 : i32
    %55 = vector.broadcast %c3_i32 : i32 to vector<1x8xi32>
    %56 = arith.cmpi eq, %0, %55 : vector<1x8xi32>
    %cst_12 = arith.constant 0.000000e+00 : f32
    %57 = vector.shape_cast %56 : vector<1x8xi1> to vector<1x8xi1>
    %58 = vector.broadcast %57 : vector<1x8xi1> to vector<8x8xi1>
    %59 = vector.shape_cast %54 : vector<8x1xf32> to vector<8x1xf32>
    %60 = vector.broadcast %59 : vector<8x1xf32> to vector<8x8xf32>
    %61 = vector.broadcast %cst_12 : f32 to vector<8x8xf32>
    %62 = arith.select %58, %60, %61 : vector<8x8xi1>, vector<8x8xf32>
    %63 = arith.addf %50, %62 : vector<8x8xf32>
    %64 = vector.extract_strided_slice %10 {offsets = [0, 128], sizes = [8, 32], strides = [1, 1]} : vector<8x256xf32> to vector<8x32xf32>
    %65 = arith.mulf %8, %64 : vector<8x32xf32>
    %cst_13 = arith.constant dense<0.000000e+00> : vector<8xf32>
    %66 = vector.multi_reduction <add>, %65, %cst_13 [1] : vector<8x32xf32> to vector<8xf32>
    %67 = vector.shape_cast %66 : vector<8xf32> to vector<8x1xf32>
    %c4_i32 = arith.constant 4 : i32
    %68 = vector.broadcast %c4_i32 : i32 to vector<1x8xi32>
    %69 = arith.cmpi eq, %0, %68 : vector<1x8xi32>
    %cst_14 = arith.constant 0.000000e+00 : f32
    %70 = vector.shape_cast %69 : vector<1x8xi1> to vector<1x8xi1>
    %71 = vector.broadcast %70 : vector<1x8xi1> to vector<8x8xi1>
    %72 = vector.shape_cast %67 : vector<8x1xf32> to vector<8x1xf32>
    %73 = vector.broadcast %72 : vector<8x1xf32> to vector<8x8xf32>
    %74 = vector.broadcast %cst_14 : f32 to vector<8x8xf32>
    %75 = arith.select %71, %73, %74 : vector<8x8xi1>, vector<8x8xf32>
    %76 = arith.addf %63, %75 : vector<8x8xf32>
    %77 = vector.extract_strided_slice %10 {offsets = [0, 160], sizes = [8, 32], strides = [1, 1]} : vector<8x256xf32> to vector<8x32xf32>
    %78 = arith.mulf %8, %77 : vector<8x32xf32>
    %cst_15 = arith.constant dense<0.000000e+00> : vector<8xf32>
    %79 = vector.multi_reduction <add>, %78, %cst_15 [1] : vector<8x32xf32> to vector<8xf32>
    %80 = vector.shape_cast %79 : vector<8xf32> to vector<8x1xf32>
    %c5_i32 = arith.constant 5 : i32
    %81 = vector.broadcast %c5_i32 : i32 to vector<1x8xi32>
    %82 = arith.cmpi eq, %0, %81 : vector<1x8xi32>
    %cst_16 = arith.constant 0.000000e+00 : f32
    %83 = vector.shape_cast %82 : vector<1x8xi1> to vector<1x8xi1>
    %84 = vector.broadcast %83 : vector<1x8xi1> to vector<8x8xi1>
    %85 = vector.shape_cast %80 : vector<8x1xf32> to vector<8x1xf32>
    %86 = vector.broadcast %85 : vector<8x1xf32> to vector<8x8xf32>
    %87 = vector.broadcast %cst_16 : f32 to vector<8x8xf32>
    %88 = arith.select %84, %86, %87 : vector<8x8xi1>, vector<8x8xf32>
    %89 = arith.addf %76, %88 : vector<8x8xf32>
    %90 = vector.extract_strided_slice %10 {offsets = [0, 192], sizes = [8, 32], strides = [1, 1]} : vector<8x256xf32> to vector<8x32xf32>
    %91 = arith.mulf %8, %90 : vector<8x32xf32>
    %cst_17 = arith.constant dense<0.000000e+00> : vector<8xf32>
    %92 = vector.multi_reduction <add>, %91, %cst_17 [1] : vector<8x32xf32> to vector<8xf32>
    %93 = vector.shape_cast %92 : vector<8xf32> to vector<8x1xf32>
    %c6_i32 = arith.constant 6 : i32
    %94 = vector.broadcast %c6_i32 : i32 to vector<1x8xi32>
    %95 = arith.cmpi eq, %0, %94 : vector<1x8xi32>
    %cst_18 = arith.constant 0.000000e+00 : f32
    %96 = vector.shape_cast %95 : vector<1x8xi1> to vector<1x8xi1>
    %97 = vector.broadcast %96 : vector<1x8xi1> to vector<8x8xi1>
    %98 = vector.shape_cast %93 : vector<8x1xf32> to vector<8x1xf32>
    %99 = vector.broadcast %98 : vector<8x1xf32> to vector<8x8xf32>
    %100 = vector.broadcast %cst_18 : f32 to vector<8x8xf32>
    %101 = arith.select %97, %99, %100 : vector<8x8xi1>, vector<8x8xf32>
    %102 = arith.addf %89, %101 : vector<8x8xf32>
    %103 = vector.extract_strided_slice %10 {offsets = [0, 224], sizes = [8, 32], strides = [1, 1]} : vector<8x256xf32> to vector<8x32xf32>
    %104 = arith.mulf %8, %103 : vector<8x32xf32>
    %cst_19 = arith.constant dense<0.000000e+00> : vector<8xf32>
    %105 = vector.multi_reduction <add>, %104, %cst_19 [1] : vector<8x32xf32> to vector<8xf32>
    %106 = vector.shape_cast %105 : vector<8xf32> to vector<8x1xf32>
    %c7_i32 = arith.constant 7 : i32
    %107 = vector.broadcast %c7_i32 : i32 to vector<1x8xi32>
    %108 = arith.cmpi eq, %0, %107 : vector<1x8xi32>
    %cst_20 = arith.constant 0.000000e+00 : f32
    %109 = vector.shape_cast %108 : vector<1x8xi1> to vector<1x8xi1>
    %110 = vector.broadcast %109 : vector<1x8xi1> to vector<8x8xi1>
    %111 = vector.shape_cast %106 : vector<8x1xf32> to vector<8x1xf32>
    %112 = vector.broadcast %111 : vector<8x1xf32> to vector<8x8xf32>
    %113 = vector.broadcast %cst_20 : f32 to vector<8x8xf32>
    %114 = arith.select %110, %112, %113 : vector<8x8xi1>, vector<8x8xf32>
    %115 = arith.addf %102, %114 : vector<8x8xf32>
    %cst_21 = arith.constant dense<0xFF800000> : vector<8xf32>
    %116 = vector.multi_reduction <maximumf>, %115, %cst_21 [1] : vector<8x8xf32> to vector<8xf32>
    %117 = vector.shape_cast %116 : vector<8xf32> to vector<8x1xf32>
    %118 = vector.broadcast %117 : vector<8x1xf32> to vector<8x8xf32>
    %119 = arith.subf %115, %118 : vector<8x8xf32>
    %120 = math.exp %119 : vector<8x8xf32>
    %cst_22 = arith.constant dense<0.000000e+00> : vector<8xf32>
    %121 = vector.multi_reduction <add>, %120, %cst_22 [1] : vector<8x8xf32> to vector<8xf32>
    %122 = vector.shape_cast %121 : vector<8xf32> to vector<8x1xf32>
    %cst_23 = arith.constant 0.000000e+00 : f32
    %123 = vector.broadcast %cst_23 : f32 to vector<8x32xf32>
    %124 = vector.extract_strided_slice %120 {offsets = [0, 0], sizes = [8, 1], strides = [1, 1]} : vector<8x8xf32> to vector<8x1xf32>
    %125 = vector.extract_strided_slice %10 {offsets = [0, 0], sizes = [8, 32], strides = [1, 1]} : vector<8x256xf32> to vector<8x32xf32>
    %126 = vector.broadcast %124 : vector<8x1xf32> to vector<8x32xf32>
    %127 = arith.mulf %126, %125 : vector<8x32xf32>
    %128 = arith.addf %123, %127 : vector<8x32xf32>
    %129 = vector.extract_strided_slice %120 {offsets = [0, 1], sizes = [8, 1], strides = [1, 1]} : vector<8x8xf32> to vector<8x1xf32>
    %130 = vector.extract_strided_slice %10 {offsets = [0, 32], sizes = [8, 32], strides = [1, 1]} : vector<8x256xf32> to vector<8x32xf32>
    %131 = vector.broadcast %129 : vector<8x1xf32> to vector<8x32xf32>
    %132 = arith.mulf %131, %130 : vector<8x32xf32>
    %133 = arith.addf %128, %132 : vector<8x32xf32>
    %134 = vector.extract_strided_slice %120 {offsets = [0, 2], sizes = [8, 1], strides = [1, 1]} : vector<8x8xf32> to vector<8x1xf32>
    %135 = vector.extract_strided_slice %10 {offsets = [0, 64], sizes = [8, 32], strides = [1, 1]} : vector<8x256xf32> to vector<8x32xf32>
    %136 = vector.broadcast %134 : vector<8x1xf32> to vector<8x32xf32>
    %137 = arith.mulf %136, %135 : vector<8x32xf32>
    %138 = arith.addf %133, %137 : vector<8x32xf32>
    %139 = vector.extract_strided_slice %120 {offsets = [0, 3], sizes = [8, 1], strides = [1, 1]} : vector<8x8xf32> to vector<8x1xf32>
    %140 = vector.extract_strided_slice %10 {offsets = [0, 96], sizes = [8, 32], strides = [1, 1]} : vector<8x256xf32> to vector<8x32xf32>
    %141 = vector.broadcast %139 : vector<8x1xf32> to vector<8x32xf32>
    %142 = arith.mulf %141, %140 : vector<8x32xf32>
    %143 = arith.addf %138, %142 : vector<8x32xf32>
    %144 = vector.extract_strided_slice %120 {offsets = [0, 4], sizes = [8, 1], strides = [1, 1]} : vector<8x8xf32> to vector<8x1xf32>
    %145 = vector.extract_strided_slice %10 {offsets = [0, 128], sizes = [8, 32], strides = [1, 1]} : vector<8x256xf32> to vector<8x32xf32>
    %146 = vector.broadcast %144 : vector<8x1xf32> to vector<8x32xf32>
    %147 = arith.mulf %146, %145 : vector<8x32xf32>
    %148 = arith.addf %143, %147 : vector<8x32xf32>
    %149 = vector.extract_strided_slice %120 {offsets = [0, 5], sizes = [8, 1], strides = [1, 1]} : vector<8x8xf32> to vector<8x1xf32>
    %150 = vector.extract_strided_slice %10 {offsets = [0, 160], sizes = [8, 32], strides = [1, 1]} : vector<8x256xf32> to vector<8x32xf32>
    %151 = vector.broadcast %149 : vector<8x1xf32> to vector<8x32xf32>
    %152 = arith.mulf %151, %150 : vector<8x32xf32>
    %153 = arith.addf %148, %152 : vector<8x32xf32>
    %154 = vector.extract_strided_slice %120 {offsets = [0, 6], sizes = [8, 1], strides = [1, 1]} : vector<8x8xf32> to vector<8x1xf32>
    %155 = vector.extract_strided_slice %10 {offsets = [0, 192], sizes = [8, 32], strides = [1, 1]} : vector<8x256xf32> to vector<8x32xf32>
    %156 = vector.broadcast %154 : vector<8x1xf32> to vector<8x32xf32>
    %157 = arith.mulf %156, %155 : vector<8x32xf32>
    %158 = arith.addf %153, %157 : vector<8x32xf32>
    %159 = vector.extract_strided_slice %120 {offsets = [0, 7], sizes = [8, 1], strides = [1, 1]} : vector<8x8xf32> to vector<8x1xf32>
    %160 = vector.extract_strided_slice %10 {offsets = [0, 224], sizes = [8, 32], strides = [1, 1]} : vector<8x256xf32> to vector<8x32xf32>
    %161 = vector.broadcast %159 : vector<8x1xf32> to vector<8x32xf32>
    %162 = arith.mulf %161, %160 : vector<8x32xf32>
    %163 = arith.addf %158, %162 : vector<8x32xf32>
    %164 = tpu.reciprocal %122 : vector<8x1xf32> -> vector<8x1xf32>
    %165 = vector.broadcast %164 : vector<8x1xf32> to vector<8x32xf32>
    %166 = arith.mulf %163, %165 : vector<8x32xf32>
    %167 = arith.index_cast %4 : i32 to index
    %c0_24 = arith.constant 0 : index
    %168 = vector.load %arg3[%167, %c0_24] : memref<8x32xf32, #tpu.memory_space<vmem>>, vector<8x32xf32>
    tpu.vector_store %arg3[%167, %c0_24], %166 {strides = array<i32>} : memref<8x32xf32, #tpu.memory_space<vmem>>, vector<8x32xf32>,
    %c1_i32_25 = arith.constant 1 : i32
    return
  }
  func.func @transform_0(%arg0: i32) -> (i32, i32) {
    %c0_i32 = arith.constant 0 : i32
    %c0_i32_0 = arith.constant 0 : i32
    return %arg0, %c0_i32 : i32, i32
  }
  func.func @transform_1(%arg0: i32) -> (i32, i32) {
    %c0_i32 = arith.constant 0 : i32
    %c0_i32_0 = arith.constant 0 : i32
    return %arg0, %c0_i32 : i32, i32
  }
  func.func @transform_2(%arg0: i32) -> (i32, i32) {
    %c0_i32 = arith.constant 0 : i32
    %c0_i32_0 = arith.constant 0 : i32
    return %arg0, %c0_i32 : i32, i32
  }
}

</mosaic_0001>

<bundles_post_ra>
// kernel: tpu_custom_call.1
= control target key start
LH: loop header
LB: loop body
LE: loop exit
PB: predicated region body
PF: predicated region fallthrough
CT: control target
= control target key end

     0   :  { %7 = vsyncpa [#allocation3], 0  ;;  %s447_s0 = inlined_call_operand.hbm [shape: f32[8,32], index: 0, kind: input, shape index: {}]   ;;  %s448_s1 = inlined_call_operand.hbm [shape: f32[8,256], index: 1, kind: input, shape index: {}]   ;;  %s449_s2 = inlined_call_operand.hbm [shape: f32[8,32], index: 2, kind: output, shape index: {}]  }
   0x1   :  { %8 = vsyncpa [#allocation6], 0 }
   0x2   :  { %9 = vsyncpa [#allocation4], 0  ;;  %s339_s9 = smov [#allocation2]   ;;  %s340_s11 = smov [#allocation5]  }
   0x3   :  { %s16_s10 = sshll.u32 %s339_s9, 4  ;;  %s26_s12 = sshll.u32 %s340_s11, 4  ;;  %s17_s10 = int_to_ptr.vmem [resolvable:$true] %s16_s10  ;;  %s27_s12 = int_to_ptr.vmem [resolvable:$true] %s26_s12 }
   0x4   :  { %s267_s15 = scalar_lea.hbm %s447_s0, 128 }
   0x5   :  { %p268_p0 = scmp.ne.s32.totalorder %s447_s0, %s267_s15  ;;  %p271_p1 = scmp.lt.u32.totalorder %s267_s15, %s447_s0 }
   0x7   :  { %p273_p2 = pnand %p271_p1, %p268_p0 }
   0x9   :  { %276 = shalt.err (!%p273_p2)
}
   0xa   :  { %s277_s20 = scalar_lea.vmem %s17_s10, 128  ;;  %p282_p4 = scmp.lt.s32.totalorder %s17_s10, %s17_s10 }
   0xb   :  { %p278_p3 = scmp.ne.s32.totalorder %s17_s10, %s277_s20  ;;  %p283_p5 = scmp.lt.s32.totalorder %s277_s20, %s277_s20 }
   0xd   :  { %p284_p6 = por %p283_p5, %p282_p4 }
   0xf   :  { %p285_p7 = pnand %p284_p6, %p278_p3 }
  0x11   :  { %288 = shalt.err (!%p285_p7)
}
  0x12   :  { %19 = dma.hbm_to_vmem [thread:$0]  %s447_s0, 128, %s17_s10, [#allocation3]  }
  0x13   :  { %s289_s25 = scalar_lea.hbm %s448_s1, 256 }
  0x14   :  { %p290_p8 = scmp.ne.s32.totalorder %s448_s1, %s289_s25  ;;  %p293_p9 = scmp.lt.u32.totalorder %s289_s25, %s448_s1 }
  0x16   :  { %p295_p10 = pnand %p293_p9, %p290_p8 }
  0x18   :  { %298 = shalt.err (!%p295_p10)
}
  0x19   :  { %s299_s30 = scalar_lea.vmem %s27_s12, 256  ;;  %p304_p12 = scmp.lt.s32.totalorder %s27_s12, %s27_s12 }
  0x1a   :  { %p300_p11 = scmp.ne.s32.totalorder %s27_s12, %s299_s30  ;;  %p305_p13 = scmp.lt.s32.totalorder %s299_s30, %s299_s30 }
  0x1c   :  { %p306_p0 = por %p305_p13, %p304_p12 }
  0x1e   :  { %p307_p1 = pnand %p306_p0, %p300_p11 }
  0x20   :  { %310 = shalt.err (!%p307_p1)
}
  0x21   :  { %29 = dma.hbm_to_vmem [thread:$0]  %s448_s1, 256, %s27_s12, [#allocation6]  }
  0x22   :  { %333 = dma.done.wait [#allocation3], 128  }
  0x23   :  { %334 = vsyncadd [#allocation3], 4294967168 }
  0x24   :  { %335 = dma.done.wait [#allocation6], 256  }
  0x25   :  { %336 = vsyncadd [#allocation6], 4294967040  ;;  %v392_v0 = vld [vmem:[#allocation5] sm:$0xff]  ;;  %s341_s4 = smov 96   ;;  %s342_s5 = smov 32   ;;  %v398_v1 = vld [vmem:[#allocation5 + $0x8] sm:$0xff]  ;;  %v36_v26 = vlaneseq }
  0x26   :  { %56 = vrot.lane.b32.xlu0 %v392_v0, %s341_s4  ;;  %80 = vrot.lane.b32.xlu1 %v392_v0, %s342_s5  ;;  %s343_s6 = smov 64   ;;  %v38_v2 = vld [vmem:[#allocation2] sm:$0xff]  ;;  %vm46_vm0 = vcmask 261120   ;;  %vm138_vm9 = vcmask 64512   ;;  %v344_v52 = vmov 1   ;;  %v345_v53 = vmov 0  }
  0x27   :  { %v39_v3 = vmul.f32 0.17677666, %v38_v2  ;;  %v37_v27 = vand.u32 127, %v36_v26  ;;  %255 = vset.pattern.permute.xlu0 %v344_v52  ;;  %254 = vset.pattern.permute.xlu1 %v345_v53  ;;  %v346_v58 = vmov 6   ;;  %v347_v59 = vmov 2   ;;  %s352_s1 = smov [#allocation7]  }
  0x28   :  { %v348_v60 = vmov 3   ;;  %v349_v61 = vmov 4   ;;  %v350_v62 = vmov 5   ;;  %v351_v63 = vmov 7   ;;  %s230_s7 = sshll.u32 %s352_s1, 4  ;;  %s231_s7 = int_to_ptr.vmem [resolvable:$true] %s230_s7 }
  0x29   :  { %v45_v4 = vmul.f32 %v392_v0, %v39_v3  ;;  %v92_v9 = vmul.f32 %v398_v1, %v39_v3  ;;  %vm63_vm1 = vcmp.eq.s32.totalorder %v37_v27, 1  ;;  %vm50_vm2 = vcmp.eq.s32.totalorder %v37_v27, 0  ;;  %s311_s8 = scalar_lea.vmem %s231_s7, 128  ;;  %p316_p3 = scmp.lt.s32.totalorder %s231_s7, %s231_s7 }
  0x2a   :  { %68 = vrot.lane.b32.xlu0 %v392_v0, %s343_s6  ;;  %102 = vrot.lane.b32.xlu1 %v398_v1, %s341_s4  ;;  %vm75_vm3 = vcmp.eq.s32.totalorder %v37_v27, 2  ;;  %vm87_vm4 = vcmp.eq.s32.totalorder %v37_v27, 3  ;;  %vm96_vm5 = vcmp.eq.s32.totalorder %v37_v27, 4  ;;  %vm109_vm6 = vcmp.eq.s32.totalorder %v37_v27, 5  ;;  %p312_p2 = scmp.ne.s32.totalorder %s231_s7, %s311_s8  ;;  %p317_p4 = scmp.lt.s32.totalorder %s311_s8, %s311_s8 }
  0x2b   :  { %v47_v5 = vsel %vm46_vm0, %v45_v4, 0.0  ;;  %v93_v15 = vsel %vm46_vm0, %v92_v9, 0.0  ;;  %vm121_vm7 = vcmp.eq.s32.totalorder %v37_v27, 6  ;;  %vm133_vm8 = vcmp.eq.s32.totalorder %v37_v27, 7 }
  0x2c   :  { %p318_p5 = por %p317_p4, %p316_p3 }
  0x2e   :  { %114 = vrot.lane.b32.xlu0 %v398_v1, %s343_s6  ;;  %126 = vrot.lane.b32.xlu1 %v398_v1, %s342_s5  ;;  %p319_p6 = pnand %p318_p5, %p312_p2 }
  0x4d   :  { %48 = vadd.xlane.f32.xlu0 %v47_v5 }
  0x98   :  { %v57_v6 = vpop.permute.xlu0 %56  ;;  %v81_v7 = vpop.permute.xlu1 %80 }
  0x99   :  { %v59_v8 = vmul.f32 %v57_v6, %v39_v3  ;;  %v83_v14 = vmul.f32 %v81_v7, %v39_v3 }
  0x9b   :  { %v60_v10 = vsel %vm46_vm0, %v59_v8, 0.0  ;;  %v84_v19 = vsel %vm46_vm0, %v83_v14, 0.0 }
  0x9c   :  { %v69_v11 = vpop.permute.xlu0 %68  ;;  %61 = vadd.xlane.f32.xlu1 %v60_v10  ;;  %v103_v12 = vpop.permute.xlu1 %102 }
  0x9d   :  { %v71_v13 = vmul.f32 %v69_v11, %v39_v3  ;;  %v105_v18 = vmul.f32 %v103_v12, %v39_v3 }
  0x9f   :  { %v72_v16 = vsel %vm46_vm0, %v71_v13, 0.0  ;;  %v106_v24 = vsel %vm46_vm0, %v105_v18, 0.0 }
  0xa0   :  { %73 = vadd.xlane.f32.xlu0 %v72_v16  ;;  %v115_v17 = vpop.permute.xlu0 %114  ;;  %94 = vadd.xlane.f32.xlu1 %v93_v15  ;;  %v127_v21 = vpop.permute.xlu1 %126 }
  0xa1   :  { %v117_v20 = vmul.f32 %v115_v17, %v39_v3  ;;  %v129_v23 = vmul.f32 %v127_v21, %v39_v3 }
  0xa3   :  { %v118_v22 = vsel %vm46_vm0, %v117_v20, 0.0  ;;  %v130_v25 = vsel %vm46_vm0, %v129_v23, 0.0 }
  0xa4   :  { %85 = vadd.xlane.f32.xlu0 %v84_v19  ;;  %119 = vadd.xlane.f32.xlu1 %v118_v22 }
  0xa8   :  { %107 = vadd.xlane.f32.xlu0 %v106_v24 }
  0xac   :  { %131 = vadd.xlane.f32.xlu0 %v130_v25 }
  0xda   :  { %v49_v28 = vpop.xlane.xlu0 %48 }
  0xdb   :  { %v53_v31 = vsel %vm50_vm2, %v49_v28, 0.0 }
 0x129   :  { %v62_v29 = vpop.xlane.xlu1 %61 }
 0x12a   :  { %v66_v30 = vsel %vm63_vm1, %v62_v29, 0.0 }
 0x12b   :  { %v67_v35 = vadd.f32 %v66_v30, %v53_v31 }
 0x12d   :  { %v74_v32 = vpop.xlane.xlu0 %73  ;;  %v95_v33 = vpop.xlane.xlu1 %94 }
 0x12e   :  { %v78_v34 = vsel %vm75_vm3, %v74_v32, 0.0  ;;  %v99_v39 = vsel %vm96_vm5, %v95_v33, 0.0 }
 0x12f   :  { %v79_v36 = vadd.f32 %v78_v34, %v67_v35 }
 0x131   :  { %v86_v37 = vpop.xlane.xlu0 %85  ;;  %v120_v41 = vpop.xlane.xlu1 %119 }
 0x132   :  { %v90_v38 = vsel %vm87_vm4, %v86_v37, 0.0  ;;  %v124_v45 = vsel %vm121_vm7, %v120_v41, 0.0 }
 0x133   :  { %v91_v40 = vadd.f32 %v90_v38, %v79_v36 }
 0x135   :  { %v100_v42 = vadd.f32 %v99_v39, %v91_v40  ;;  %v108_v43 = vpop.xlane.xlu0 %107 }
 0x136   :  { %v112_v44 = vsel %vm109_vm6, %v108_v43, 0.0 }
 0x137   :  { %v113_v46 = vadd.f32 %v112_v44, %v100_v42 }
 0x139   :  { %v125_v47 = vadd.f32 %v124_v45, %v113_v46  ;;  %v132_v48 = vpop.xlane.xlu0 %131 }
 0x13a   :  { %v136_v49 = vsel %vm133_vm8, %v132_v48, 0.0 }
 0x13b   :  { %v137_v50 = vadd.f32 %v136_v49, %v125_v47 }
 0x13d   :  { %v139_v51 = vsel %vm138_vm9, %v137_v50, -inf }
 0x13e   :  { %140 = vmax.xlane.f32.xlu1 %v139_v51 }
 0x1cb   :  { %v141_v54 = vpop.xlane.xlu1 %140 }
 0x1cc   :  { %v142_v55 = vsub.f32 %v137_v50, %v141_v54 }
 0x1ce   :  { %v143_v56 = vmul.f32 1.442695, %v142_v55 }
 0x1d0   :  { %263 = vpow2.f32 %v143_v56 }
 0x1da   :  { %v264_v57 = vpop.eup %263 }
 0x1db   :  { %156 = vperm.xlu0 %255, %v264_v57   ;;  %150 = vperm.xlu1 %254, %v264_v57   ;;  %v145_v2 = vsel %vm138_vm9, %v264_v57, 0.0 }
 0x1df   :  { %260 = vset.pattern.permute.xlu0 %v346_v58  ;;  %256 = vset.pattern.permute.xlu1 %v347_v59 }
 0x1e0   :  { %202 = vperm.xlu0 %260, %v264_v57   ;;  %166 = vperm.xlu1 %256, %v264_v57  }
 0x1e4   :  { %257 = vset.pattern.permute.xlu1 %v348_v60  ;;  %262 = vset.pattern.permute.xlu0 %v351_v63 }
 0x1e5   :  { %176 = vperm.xlu1 %257, %v264_v57  }
 0x1e9   :  { %258 = vset.pattern.permute.xlu1 %v349_v61 }
 0x1ea   :  { %186 = vperm.xlu1 %258, %v264_v57  }
 0x1ee   :  { %259 = vset.pattern.permute.xlu1 %v350_v62 }
 0x1ef   :  { %192 = vperm.xlu1 %259, %v264_v57  }
 0x1f3   :  { %261 = vset.pattern.permute.xlu1 %v351_v63 }
 0x1ff   :  { %146 = vadd.xlane.f32.xlu0 %v145_v2 }
 0x25a   :  { %v157_v3 = vpop.permute.xlu0 %156  ;;  %v151_v4 = vpop.permute.xlu1 %150 }
 0x25b   :  { %v159_v5 = vmul.f32 %v157_v3, %v392_v0  ;;  %v153_v15 = vmul.f32 %v151_v4, %v392_v0 }
 0x25d   :  { %161 = vrot.lane.b32.xlu1 %v159_v5, %s341_s4 }
 0x25f   :  { %v167_v6 = vpop.permute.xlu1 %166  ;;  %v203_v13 = vpop.permute.xlu0 %202 }
 0x260   :  { %v169_v7 = vmul.f32 %v167_v6, %v392_v0  ;;  %v205_v14 = vmul.f32 %v203_v13, %v398_v1 }
 0x262   :  { %171 = vrot.lane.b32.xlu1 %v169_v7, %s343_s6 }
 0x264   :  { %v177_v8 = vpop.permute.xlu1 %176 }
 0x265   :  { %v179_v9 = vmul.f32 %v177_v8, %v392_v0 }
 0x267   :  { %181 = vrot.lane.b32.xlu1 %v179_v9, %s342_s5 }
 0x269   :  { %v187_v10 = vpop.permute.xlu1 %186 }
 0x26a   :  { %v189_v21 = vmul.f32 %v187_v10, %v398_v1 }
 0x26e   :  { %v193_v11 = vpop.permute.xlu1 %192 }
 0x26f   :  { %v195_v12 = vmul.f32 %v193_v11, %v398_v1 }
 0x271   :  { %197 = vrot.lane.b32.xlu1 %v195_v12, %s341_s4 }
 0x275   :  { %207 = vrot.lane.b32.xlu1 %v205_v14, %s343_s6 }
 0x279   :  { %212 = vperm.xlu1 %261, %v264_v57  }
 0x28c   :  { %v147_v30 = vpop.xlane.xlu0 %146 }
 0x28d   :  { %265 = vrcp.f32 %v147_v30 }
 0x297   :  { %v266_v32 = vpop.eup %265 }
 0x2cf   :  { %v162_v16 = vpop.permute.xlu1 %161 }
 0x2d0   :  { %v164_v17 = vadd.f32 %v162_v16, %v153_v15 }
 0x2d4   :  { %v172_v18 = vpop.permute.xlu1 %171 }
 0x2d5   :  { %v174_v19 = vadd.f32 %v172_v18, %v164_v17 }
 0x2d9   :  { %v182_v20 = vpop.permute.xlu1 %181 }
 0x2da   :  { %v184_v22 = vadd.f32 %v182_v20, %v174_v19 }
 0x2dc   :  { %v190_v23 = vadd.f32 %v189_v21, %v184_v22 }
 0x2e3   :  { %v198_v24 = vpop.permute.xlu1 %197 }
 0x2e4   :  { %v200_v25 = vadd.f32 %v198_v24, %v190_v23 }
 0x2e7   :  { %v208_v26 = vpop.permute.xlu1 %207 }
 0x2e8   :  { %v210_v27 = vadd.f32 %v208_v26, %v200_v25 }
 0x2f8   :  { %v213_v28 = vpop.permute.xlu1 %212 }
 0x2f9   :  { %v215_v29 = vmul.f32 %v213_v28, %v398_v1 }
 0x2fb   :  { %217 = vrot.lane.b32.xlu0 %v215_v29, %s342_s5 }
 0x36d   :  { %v218_v0 = vpop.permute.xlu0 %217 }
 0x36e   :  { %v220_v31 = vadd.f32 %v218_v0, %v210_v27 }
 0x370   :  { %v222_v33 = vmul.f32 %v266_v32, %v220_v31 }
 0x372   :  { %223 = vst.msk [vmem:[#allocation7] sm:$0xff] %vm46_vm0, %v222_v33 }
 0x373   :  { %322 = shalt.err (!%p319_p6)
}
 0x374   :  { %s323_s11 = scalar_lea.hbm %s449_s2, 128 }
 0x375   :  { %p324_p7 = scmp.ne.s32.totalorder %s449_s2, %s323_s11  ;;  %p327_p8 = scmp.lt.u32.totalorder %s323_s11, %s449_s2 }
 0x377   :  { %p329_p9 = pnand %p327_p8, %p324_p7 }
 0x379   :  { %332 = shalt.err (!%p329_p9)
}
 0x37a   :  { %233 = dma.vmem_to_hbm [thread:$0]  %s231_s7, 128, %s449_s2, [#allocation4]  }
 0x37b   :  { %337 = dma.done.wait [#allocation4], 128  }
 0x37c   :  { %338 = vsyncadd [#allocation4], 4294967168 }
 0x37d   :  { %237 = vsyncpa [#allocation3], 1 }
 0x37e   :  { %238 = vsyncpa [#allocation6], 1 }
 0x37f   :  { %239 = vsyncpa [#allocation4], 1 }

</bundles_post_ra>
